<compile_context>
chip_gen: v7x
topology: tpu7x:2x2x1
jax: 0.10.0
libtpu: 0.0.40
codegen_flags: <defaults>
</compile_context>

<pallas_src>
import jax
import jax.numpy as jnp
import numpy as np
from jax.experimental import pallas as pl
from jax.experimental.pallas import tpu as pltpu


def _attention_kernel(e1_ref, e2_ref, w_ref, u_ref, out_ref, alpha_ref):
    e1 = e1_ref[...]                                    # (tm, in_feat), native dtype
    e2 = e2_ref[...]
    w = w_ref[...]                                      # (in_feat, out_feat)
    u = u_ref[...].astype(jnp.float32)                  # (1, out_feat)

    # Per-modality MXU matmul + tanh (f32 accumulation). No sublane concat /
    # slice copies.
    v1 = jnp.tanh(jnp.dot(e1, w, preferred_element_type=jnp.float32))   # (tm, out_feat)
    v2 = jnp.tanh(jnp.dot(e2, w, preferred_element_type=jnp.float32))

    # Score per modality: v @ u_omega (VPU mul + lane reduce; out_feat small).
    s1 = jnp.sum(v1 * u, axis=-1, keepdims=True)        # (tm, 1)
    s2 = jnp.sum(v2 * u, axis=-1, keepdims=True)

    # 2-way softmax == sigmoid of the score difference (the reference's +1e-6
    # is added to both scores and cancels exactly). Each weight gets its own
    # sigmoid so the smaller one keeps full relative precision.
    a1 = jax.nn.sigmoid(s1 - s2)                        # (tm, 1) f32
    a2 = jax.nn.sigmoid(s2 - s1)

    # Weighted combine: e2 + a1*(e1 - e2) == a1*e1 + (1-a1)*e2, one broadcast mul.
    e1f = e1.astype(jnp.float32)
    e2f = e2.astype(jnp.float32)
    out_ref[...] = (e2f + a1 * (e1f - e2f)).astype(out_ref.dtype)

    # alpha block is (tm, 2): last dim equals the full array dim.
    alpha_ref[...] = jnp.concatenate([a1, a2], axis=-1).astype(alpha_ref.dtype)


def _round_up(x, m):
    return (x + m - 1) // m * m


def _vmem_limit_bytes():
    """Explicit scoped-VMEM limit: 32 MiB is physically safe on v5e/v6e
    (128 MiB VMEM) and v7x (64 MiB VMEM), and raises the 16 MiB v5e scoped
    default so the row tile is no longer starved on any generation."""
    limit = 32 * 1024 * 1024
    try:  # generation-aware clamp when the info query is available
        cap = int(pltpu.get_tpu_info().vmem_capacity_bytes)
        limit = min(limit, cap // 2)
    except Exception:
        pass
    return max(limit, 16 * 1024 * 1024)


def _choose_tm(n_rows, in_feat, out_feat, itemsize, budget):
    """Row tile: as large as fits the VMEM budget (amortize the ~0.35us
    per-grid-step overhead), capped at 2048 and at >=2 grid steps (v7x has two
    TensorCores sharded over the parallel grid axis)."""
    w_bytes = (in_feat * out_feat + out_feat) * 4 * 2   # weights, double-buffered
    per_row = (2 * 2 * in_feat * itemsize               # emb1/emb2, double-buffered
               + 2 * in_feat * itemsize                 # out, double-buffered
               + 2 * 2 * 4                              # alpha (tm, 2) f32, double-buffered
               + 2 * out_feat * 4                       # tanh(v1/v2) f32 temps
               + 3 * in_feat * 4)                       # f32 combine temps
    tm = (budget - w_bytes) // max(per_row, 1)
    tm = int(max(8, min(2048, tm)))
    tm = max(8, (tm // 8) * 8)                          # multiple of 8 (sublane)
    tm = min(tm, _round_up(n_rows, 8))                  # never bigger than the input
    if n_rows > 8:
        # keep at least 2 grid steps so both v7x TensorCores get work
        tm = min(tm, max(8, _round_up((n_rows + 1) // 2, 8)))
    return tm


def attention_layer(emb1, emb2, w_omega, u_omega, *, tm=None):
    """Pallas implementation of AttentionLayer.forward.

    emb1, emb2 : (N, in_feat)
    w_omega    : (in_feat, out_feat)
    u_omega    : (out_feat, 1)
    Returns (out (N, in_feat), alpha (N, 2))
    """
    N, in_feat = emb1.shape
    out_feat = w_omega.shape[1]
    itemsize = jnp.dtype(emb1.dtype).itemsize

    vmem_limit = _vmem_limit_bytes()
    if tm is None:
        tm = _choose_tm(N, in_feat, out_feat, itemsize, budget=(vmem_limit * 3) // 4)
    else:
        tm = max(8, (int(tm) // 8) * 8)
        tm = min(tm, _round_up(N, 8))

    # No wrapper padding / slicing: cdiv grid, boundary block is masked by Pallas.
    # Safe because every row is computed independently.
    grid = (pl.cdiv(N, tm),)

    u_row = u_omega.reshape(1, out_feat)

    out_shapes = (
        jax.ShapeDtypeStruct((N, in_feat), emb1.dtype),
        jax.ShapeDtypeStruct((N, 2), jnp.float32),
    )

    grid_spec = pltpu.PrefetchScalarGridSpec(
        num_scalar_prefetch=0,
        grid=grid,
        in_specs=[
            pl.BlockSpec((tm, in_feat), lambda i: (i, 0)),        # emb1 tile
            pl.BlockSpec((tm, in_feat), lambda i: (i, 0)),        # emb2 tile
            pl.BlockSpec((in_feat, out_feat), lambda i: (0, 0)),  # w_omega (resident)
            pl.BlockSpec((1, out_feat), lambda i: (0, 0)),        # u_omega row (resident)
        ],
        out_specs=[
            pl.BlockSpec((tm, in_feat), lambda i: (i, 0)),        # combined emb
            pl.BlockSpec((tm, 2), lambda i: (i, 0)),              # alpha
        ],
    )

    cost = pl.CostEstimate(
        flops=int(4 * N * in_feat * out_feat + 4 * N * in_feat),
        transcendentals=int(2 * N * out_feat + 2 * N),
        bytes_accessed=int(3 * N * in_feat * itemsize + N * 2 * 4
                           + (in_feat * out_feat + out_feat) * 4),
    )

    out, alpha = pl.pallas_call(
        _attention_kernel,
        out_shape=out_shapes,
        grid_spec=grid_spec,
        compiler_params=pltpu.CompilerParams(
            dimension_semantics=("parallel",),
            vmem_limit_bytes=vmem_limit,
        ),
        cost_estimate=cost,
    )(emb1, emb2, w_omega, u_row)

    return out, alpha


def _reference(emb1, emb2, w_omega, u_omega):
    emb = jnp.stack([emb1, emb2], axis=1)                       # (N, 2, in_feat)
    v = jnp.tanh(jnp.einsum("nmi,io->nmo", emb, w_omega))       # (N, 2, out_feat)
    vu = jnp.einsum("nmo,o->nm", v, u_omega[:, 0])              # (N, 2)
    alpha = jax.nn.softmax(vu + 1e-6, axis=1)                   # (N, 2)
    out = jnp.einsum("nmi,nm->ni", emb, alpha)                  # (N, in_feat)
    return out, alpha


def _xavier_uniform(key, shape):
    fan_in, fan_out = shape[0], shape[1]
    bound = float(np.sqrt(6.0 / (fan_in + fan_out)))
    return jax.random.uniform(key, shape, jnp.float32, -bound, bound)


if __name__ == "__main__":
    in_feat, out_feat = 32, 16

    key = jax.random.PRNGKey(0)
    k1, k2, kw, ku = jax.random.split(key, 4)

    w_omega = _xavier_uniform(kw, (in_feat, out_feat))
    u_omega = _xavier_uniform(ku, (out_feat, 1))

    # N = 16 (aligned) and N = 13 (exercises the masked boundary block / no-pad path).
    for N in (16, 13):
        ka, kb = jax.random.split(jax.random.fold_in(key, N), 2)
        emb1 = jax.random.normal(ka, (N, in_feat), jnp.float32)
        emb2 = jax.random.normal(kb, (N, in_feat), jnp.float32)

        out, alpha = attention_layer(emb1, emb2, w_omega, u_omega)
        jax.block_until_ready((out, alpha))

        ref_out, ref_alpha = _reference(emb1, emb2, w_omega, u_omega)
        np.testing.assert_allclose(np.asarray(out), np.asarray(ref_out),
                                   rtol=1e-5, atol=1e-5)
        np.testing.assert_allclose(np.asarray(alpha), np.asarray(ref_alpha),
                                   rtol=1e-5, atol=1e-5)

    print("KERNEL_OK")
</pallas_src>

<mosaic_0001>
module attributes {stable_mosaic.version = 11 : i64} {
  func.func @_attention_kernel(%arg0: i32, %arg1: memref<8x32xf32, #tpu.memory_space<vmem>>, %arg2: memref<8x32xf32, #tpu.memory_space<vmem>>, %arg3: memref<32x16xf32, #tpu.memory_space<vmem>>, %arg4: memref<1x16xf32, #tpu.memory_space<vmem>>, %arg5: memref<8x32xf32, #tpu.memory_space<vmem>>, %arg6: memref<8x2xf32, #tpu.memory_space<vmem>>) attributes {dimension_semantics = [#tpu.dimension_semantics<parallel>], iteration_bounds = array<i64: 2>, scalar_prefetch = 0 : i64, scratch_operands = 0 : i64, tpu.core_type = #tpu.core_type<tc>, window_params = [{transform_indices = @transform_0, window_bounds = array<i64: 8, 32>}, {transform_indices = @transform_1, window_bounds = array<i64: 8, 32>}, {pipeline_mode = #tpu.pipeline_mode<synchronous>, transform_indices = @transform_2, window_bounds = array<i64: 32, 16>}, {pipeline_mode = #tpu.pipeline_mode<synchronous>, transform_indices = @transform_3, window_bounds = array<i64: 1, 16>}, {transform_indices = @transform_4, window_bounds = array<i64: 8, 32>}, {transform_indices = @transform_5, window_bounds = array<i64: 8, 2>}]} {
    %c0 = arith.constant 0 : index
    %c0_0 = arith.constant 0 : index
    %0 = vector.load %arg1[%c0, %c0_0] : memref<8x32xf32, #tpu.memory_space<vmem>>, vector<8x32xf32>
    %c0_1 = arith.constant 0 : index
    %c0_2 = arith.constant 0 : index
    %1 = vector.load %arg2[%c0_1, %c0_2] : memref<8x32xf32, #tpu.memory_space<vmem>>, vector<8x32xf32>
    %c0_3 = arith.constant 0 : index
    %c0_4 = arith.constant 0 : index
    %2 = vector.load %arg3[%c0_3, %c0_4] : memref<32x16xf32, #tpu.memory_space<vmem>>, vector<32x16xf32>
    %c0_5 = arith.constant 0 : index
    %c0_6 = arith.constant 0 : index
    %3 = vector.load %arg4[%c0_5, %c0_6] : memref<1x16xf32, #tpu.memory_space<vmem>>, vector<1x16xf32>
    %cst = arith.constant dense<0.000000e+00> : vector<8x16xf32>
    %4 = tpu.matmul %0, %2, %cst {dimension_numbers = #tpu.dot_dimension_numbers<[1], [0], [0], [1], [0, 0, 1, 1], [], []>} : vector<8x32xf32>, vector<32x16xf32>, vector<8x16xf32> -> vector<8x16xf32>
    %5 = math.tanh %4 : vector<8x16xf32>
    %cst_7 = arith.constant dense<0.000000e+00> : vector<8x16xf32>
    %6 = tpu.matmul %1, %2, %cst_7 {dimension_numbers = #tpu.dot_dimension_numbers<[1], [0], [0], [1], [0, 0, 1, 1], [], []>} : vector<8x32xf32>, vector<32x16xf32>, vector<8x16xf32> -> vector<8x16xf32>
    %7 = math.tanh %6 : vector<8x16xf32>
    %8 = vector.broadcast %3 : vector<1x16xf32> to vector<8x16xf32>
    %9 = arith.mulf %5, %8 : vector<8x16xf32>
    %cst_8 = arith.constant dense<0.000000e+00> : vector<8xf32>
    %10 = vector.multi_reduction <add>, %9, %cst_8 [1] : vector<8x16xf32> to vector<8xf32>
    %11 = vector.shape_cast %10 : vector<8xf32> to vector<8x1xf32>
    %12 = vector.broadcast %3 : vector<1x16xf32> to vector<8x16xf32>
    %13 = arith.mulf %7, %12 : vector<8x16xf32>
    %cst_9 = arith.constant dense<0.000000e+00> : vector<8xf32>
    %14 = vector.multi_reduction <add>, %13, %cst_9 [1] : vector<8x16xf32> to vector<8xf32>
    %15 = vector.shape_cast %14 : vector<8xf32> to vector<8x1xf32>
    %16 = arith.subf %11, %15 : vector<8x1xf32>
    %17 = arith.negf %16 : vector<8x1xf32>
    %18 = math.exp %17 : vector<8x1xf32>
    %cst_10 = arith.constant 1.000000e+00 : f32
    %19 = vector.broadcast %cst_10 : f32 to vector<8x1xf32>
    %20 = arith.addf %19, %18 : vector<8x1xf32>
    %21 = arith.divf %19, %20 : vector<8x1xf32>
    %22 = arith.subf %15, %11 : vector<8x1xf32>
    %23 = arith.negf %22 : vector<8x1xf32>
    %24 = math.exp %23 : vector<8x1xf32>
    %cst_11 = arith.constant 1.000000e+00 : f32
    %25 = vector.broadcast %cst_11 : f32 to vector<8x1xf32>
    %26 = arith.addf %25, %24 : vector<8x1xf32>
    %27 = arith.divf %25, %26 : vector<8x1xf32>
    %28 = arith.subf %0, %1 : vector<8x32xf32>
    %29 = vector.broadcast %21 : vector<8x1xf32> to vector<8x32xf32>
    %30 = arith.mulf %29, %28 : vector<8x32xf32>
    %31 = arith.addf %1, %30 : vector<8x32xf32>
    %c0_12 = arith.constant 0 : index
    %c0_13 = arith.constant 0 : index
    %32 = vector.load %arg5[%c0_12, %c0_13] : memref<8x32xf32, #tpu.memory_space<vmem>>, vector<8x32xf32>
    tpu.vector_store %arg5[%c0_12, %c0_13], %31 {strides = array<i32>} : memref<8x32xf32, #tpu.memory_space<vmem>>, vector<8x32xf32>,
    %33 = tpu.concatenate %21, %27 in 1 : vector<8x1xf32>, vector<8x1xf32> -> vector<8x2xf32>
    %c0_14 = arith.constant 0 : index
    %c0_15 = arith.constant 0 : index
    %34 = vector.load %arg6[%c0_14, %c0_15] : memref<8x2xf32, #tpu.memory_space<vmem>>, vector<8x2xf32>
    tpu.vector_store %arg6[%c0_14, %c0_15], %33 {strides = array<i32>} : memref<8x2xf32, #tpu.memory_space<vmem>>, vector<8x2xf32>,
    return
  }
  func.func @transform_0(%arg0: i32) -> (i32, i32) {
    %c0_i32 = arith.constant 0 : i32
    %c0_i32_0 = arith.constant 0 : i32
    return %arg0, %c0_i32 : i32, i32
  }
  func.func @transform_1(%arg0: i32) -> (i32, i32) {
    %c0_i32 = arith.constant 0 : i32
    %c0_i32_0 = arith.constant 0 : i32
    return %arg0, %c0_i32 : i32, i32
  }
  func.func @transform_2(%arg0: i32) -> (i32, i32) {
    %c0_i32 = arith.constant 0 : i32
    %c0_i32_0 = arith.constant 0 : i32
    %c0_i32_1 = arith.constant 0 : i32
    return %c0_i32, %c0_i32_0 : i32, i32
  }
  func.func @transform_3(%arg0: i32) -> (i32, i32) {
    %c0_i32 = arith.constant 0 : i32
    %c0_i32_0 = arith.constant 0 : i32
    %c0_i32_1 = arith.constant 0 : i32
    return %c0_i32, %c0_i32_0 : i32, i32
  }
  func.func @transform_4(%arg0: i32) -> (i32, i32) {
    %c0_i32 = arith.constant 0 : i32
    %c0_i32_0 = arith.constant 0 : i32
    return %arg0, %c0_i32 : i32, i32
  }
  func.func @transform_5(%arg0: i32) -> (i32, i32) {
    %c0_i32 = arith.constant 0 : i32
    %c0_i32_0 = arith.constant 0 : i32
    return %arg0, %c0_i32 : i32, i32
  }
}

</mosaic_0001>

<bundles_post_ra>
// kernel: tpu_custom_call.1
= control target key start
LH: loop header
LB: loop body
LE: loop exit
PB: predicated region body
PF: predicated region fallthrough
CT: control target
= control target key end

     0   :  { %11 = vsyncpa [#allocation3], 0  ;;  %s899_s0 = inlined_call_operand.vmem [shape: f32[16,32], index: 0, kind: input, shape index: {}]   ;;  %s900_s1 = inlined_call_operand.vmem [shape: f32[16,32], index: 1, kind: input, shape index: {}]   ;;  %s901_s2 = inlined_call_operand.vmem [shape: f32[32,16], index: 2, kind: input, shape index: {}]   ;;  %s902_s3 = inlined_call_operand.vmem [shape: f32[1,16], index: 3, kind: input, shape index: {}]   ;;  %s903_s4 = inlined_call_operand.hbm [shape: f32[16,32], index: 4, kind: output, shape index: {0}]   ;;  %s904_s5 = inlined_call_operand.vmem [shape: f32[16,2], index: 5, kind: output, shape index: {1}]  }
   0x1   :  { %13 = vsyncpa [#allocation3 + $0x1], 0  ;;  %s770_s18 = smov 0   ;;  %s772_s19 = smov 0  }
   0x2   :  { %s774_s20 = smov 0   ;;  %s776_s21 = smov 0  }
   0x3 LB: > { %s791_s22 = sadd.s32 4294967295, %s734_s21   ;;  %s557_s23 = sadd.s32 4294967294, %s734_s21   ;;  %s734_s21 = sphi %s776_s21, %s910_s21   ;;  %s730_s20 = sphi %s774_s20, %s909_s20   ;;  %s726_s19 = sphi %s772_s19, %s908_s19   ;;  %s722_s18 = sphi %s770_s18, %s907_s18  }
   0x4   : > { %s795_s24 = sadd.s32 1, %s734_s21   ;;  %s120_s25 = sadd.s32 1, %s730_s20 }
   0x5   : > { %s117_s26 = ssub.s32 %s734_s21, %s795_s24  ;;  %p130_p0 = scmp.ne.s32.totalorder %s730_s20, %s726_s19 }
   0x6   : > { %p118_p1 = scmp.eq.s32.totalorder %s117_s26, 0  ;;  %p131_p2 = scmp.eq.s32.totalorder %s791_s22, 1 }
   0x7   : > { %p136_p3 = scmp.ne.s32.totalorder %s726_s19, %s722_s18  ;;  %p137_p4 = scmp.eq.s32.totalorder %s557_s23, 1 }
   0x8   : > { %s806_s27 = scalar_select %p118_p1, %s730_s20, %s120_s25  }
   0x9   : > { %p808_p5 = por %p131_p2, %p130_p0  ;;  %p812_p6 = por %p137_p4, %p136_p3 }
   0xa   : > { %p560_p7 = scmp.ge.s32.totalorder %s734_s21, 1  ;;  %p201_p8 = scmp.lt.s32.totalorder %s734_s21, 3 }
   0xc   : > { %p202_p9 = pnand %p560_p7, %p201_p8 }
   0xd   : > { %v250_v0 = vld [vmem:[%s901_s2] sm:$0xff] (!%p202_p9)  ;;  %v251_v1 = vld [vmem:[%s901_s2 + $0x8] sm:$0xff] (!%p202_p9)  ;;  %v252_v2 = vld [vmem:[%s901_s2 + $0x10] sm:$0xff] (!%p202_p9)  ;;  %v736_v3 = vmov (!%p202_p9), 0.0|0.0   ;;  %p236_p10 = scmp.lt.s32.totalorder (!%p202_p9), %s791_s22, 1  ;;  %vm737_vm0 = vmmov (!%p202_p9), 0  }
   0xe   : > { %205 = sbr.rel (%p202_p9) target bundleno = 444 (0x1bc), region = 36  ;;  %606 = vmatprep.subr.bf16.mxu0 (!%p202_p9), %v736_v3  ;;  %v607_v4 = vpack.c.bf16 (!%p202_p9), %v251_v1, %v250_v0  ;;  %612 = vmatprep.subr.bf16.mxu1 (!%p202_p9), %v736_v3  ;;  %v253_v5 = vld [vmem:[%s901_s2 + $0x18] sm:$0xff] (!%p202_p9)  ;;  %v738_v6 = vmov (!%p202_p9), 0.0   ;;  %vm255_vm1 = vcmask (!%p202_p9), 261120   ;;  %v567_v14 = vld [vmem:[%s902_s3] ss:$0 sm:$0xff] (!%p202_p9) }
   0xf   : > { %592 = vmatprep.mubr.msk.f32.mxu0 (!%p202_p9), %vm737_vm0, %v738_v6  ;;  %603 = vmatprep.mubr.msk.f32.mxu1 (!%p202_p9), %vm737_vm0, %v738_v6  ;;  %v610_v7 = vpack.c.bf16 (!%p202_p9), %v253_v5, %v252_v2  ;;  %vm411_vm2 = vcmask (!%p202_p9), 130048   ;;  %s227_s7 = sand.u32 (!%p202_p9), 1, %s726_s19   ;;  %vm437_vm3 = vcmask (!%p202_p9), 7168   ;;  %vm439_vm4 = vcmask (!%p202_p9), 15360   ;;  %s571_s12 = sshll.u32 (!%p202_p9), %s791_s22, 7 }
  0x10   : > { %608 = vmatpush3.bf16.msra.mxu0 (!%p202_p9), %v607_v4  ;;  %614 = vmatpush3.bf16.msra.mxu1 (!%p202_p9), %v607_v4  ;;  %s561_s8 = sshll.u32 (!%p202_p9), %s227_s7, 3  ;;  %s856_s23 = scalar_lea.hbm (!%p202_p9), %s903_s4, %s571_s12 }
  0x11   : > { %609 = vmatprep.subr.bf16.mxu0 (!%p202_p9), %v736_v3  ;;  %615 = vmatprep.subr.bf16.mxu1 (!%p202_p9), %v736_v3  ;;  %s739_s25 = smov (!%p202_p9), [#allocation2]  }
  0x14   : > { %611 = vmatpush3.bf16.msra.mxu0 (!%p202_p9), %v610_v7  ;;  %617 = vmatpush3.bf16.msra.mxu1 (!%p202_p9), %v610_v7 }
  0x15   : > { %s237_s13 = scalar_select %p236_p10, %s791_s22, 1 }
  0x16   : > { %s442_s22 = scalar_lea.sflag [#allocation3], %s227_s7 }
  0x17   : > { %s832_s14 = sshll.u32 %s237_s13, 3  ;;  %s229_s13 = scalar_lea.vmem [#allocation2], %s561_s8 }
  0x18   : > { %s239_s17 = scalar_lea.vmem %s899_s0, %s832_s14  ;;  %s243_s26 = scalar_lea.vmem %s900_s1, %s832_s14 }
  0x19   : > { %v248_v8 = vld [vmem:[%s239_s17] sm:$0xff]  ;;  %s247_s11 = scalar_lea.vmem %s904_s5, %s832_s14  ;;  %s459_s15 = sshll.u32 %s229_s13, 4  ;;  %s858_s15 = int_to_ptr.vmem [resolvable:$true] %s459_s15 }
  0x1a   : > { %v249_v9 = vld [vmem:[%s243_s26] sm:$0xff]  ;;  %593 = vmatmul.mubr.msk.f32.vlgmr.msra.gmra.mrb[0].mxu0 %vm255_vm1, %v248_v8  ;;  %s672_s14 = scalar_lea.vmem %s858_s15, 128  ;;  %s676_s26 = sshll.u32 %s739_s25, 4  ;;  %s677_s26 = int_to_ptr.vmem [resolvable:$false] %s676_s26 }
  0x1b   : > { %604 = vmatmul.mubr.msk.f32.vlgmr.msra.gmra.mrb[0].mxu1 %vm255_vm1, %v249_v9  ;;  %v433_v31 = vsub.f32 %v248_v8, %v249_v9  ;;  %p673_p11 = scmp.ne.s32.totalorder %s858_s15, %s672_s14  ;;  %s678_s30 = scalar_lea.vmem %s677_s26, 256 }
  0x1c   : > { %p679_p0 = scmp.lt.s32.totalorder %s858_s15, %s677_s26  ;;  %p680_p1 = scmp.lt.s32.totalorder %s678_s30, %s672_s14 }
  0x1d   : > { %p674_p12 = pnand %p673_p11, %p808_p5 }
  0x1e   : > { %p681_p2 = por %p680_p1, %p679_p0 }
  0x1f   : > { %p675_p13 = pneg %p674_p12 }
  0x21   : > { %p682_p3 = pnand %p681_p2, %p675_p13 }
  0xed   : > { %v325_v10 = vpop.f32.mrb[0].mxu0 }
  0xee   : > { %v399_v11 = vpop.f32.mrb[0].mxu1  ;;  %660 = vtanh.f32 %v325_v10  ;;  %v594_v12 = vpop.f32.mrb[1].mxu0 }
  0xef   : > { %v605_v13 = vpop.f32.mrb[1].mxu1  ;;  %662 = vtanh.f32 %v399_v11 }
  0xf8   : > { %v661_v15 = vpop.eup %660 }
  0xf9   : > { %v663_v16 = vpop.eup %662  ;;  %v410_v17 = vmul.f32 %v661_v15, %v567_v14 }
  0xfa   : > { %v415_v18 = vmul.f32 %v663_v16, %v567_v14 }
  0xfb   : > { %v412_v19 = vsel %vm411_vm2, %v410_v17, 0.0 }
  0xfc   : > { %413 = vadd.xlane.f32.xlu0 %v412_v19  ;;  %v416_v20 = vsel %vm411_vm2, %v415_v18, 0.0 }
 0x100   : > { %417 = vadd.xlane.f32.xlu0 %v416_v20 }
 0x189   : > { %v414_v21 = vpop.xlane.xlu0 %413 }
 0x18d   : > { %v418_v22 = vpop.xlane.xlu0 %417 }
 0x18e   : > { %v419_v23 = vsub.f32 %v414_v21, %v418_v22  ;;  %v426_v24 = vsub.f32 %v418_v22, %v414_v21 }
 0x190   : > { %v568_v25 = vmul.f32 -1.442695, %v419_v23  ;;  %v569_v26 = vmul.f32 -1.442695, %v426_v24 }
 0x192   : > { %664 = vpow2.f32 %v568_v25 }
 0x193   : > { %666 = vpow2.f32 %v569_v26 }
 0x19c   : > { %v665_v27 = vpop.eup %664 }
 0x19d   : > { %v667_v28 = vpop.eup %666  ;;  %v423_v29 = vadd.f32 1.0, %v665_v27 }
 0x19e   : > { %v430_v30 = vadd.f32 1.0, %v667_v28 }
 0x19f   : > { %668 = vrcp.f32 %v423_v29 }
 0x1a0   : > { %670 = vrcp.f32 %v430_v30 }
 0x1a9   : > { %v669_v32 = vpop.eup %668 }
 0x1aa   : > { %v671_v33 = vpop.eup %670  ;;  %v434_v34 = vmul.f32 %v669_v32, %v433_v31 }
 0x1ab   : > { %v438_v35 = vsel %vm437_vm3, %v669_v32, %v671_v33 }
 0x1ac   : > { %440 = vst.msk [vmem:[%s247_s11] sm:$0xff] %vm439_vm4, %v438_v35  ;;  %v435_v36 = vadd.f32 %v434_v34, %v249_v9 }
 0x1ae   : > { %436 = vst.msk [vmem:[%s229_s13] sm:$0xff] %vm255_vm1, %v435_v36 }
 0x1af   : > { %685 = shalt.err (!%p682_p3)
}
 0x1b0   : > { %s686_s6 = scalar_lea.hbm %s856_s23, 128  ;;  %s690_s9 = scalar_lea.hbm %s903_s4, 256 }
 0x1b1   : > { %p687_p4 = scmp.ne.s32.totalorder %s856_s23, %s686_s6  ;;  %p691_p9 = scmp.lt.u32.totalorder %s856_s23, %s903_s4 }
 0x1b2   : > { %p692_p10 = scmp.lt.u32.totalorder %s690_s9, %s686_s6  ;;  %p694_p12 = scmp.lt.u32.totalorder %s686_s6, %s856_s23 }
 0x1b3   : > { %p688_p7 = pnand %p687_p4, %p808_p5 }
 0x1b4   : > { %p693_p11 = por %p692_p10, %p691_p9 }
 0x1b5   : > { %p689_p8 = pneg %p688_p7 }
 0x1b6   : > { %p695_p13 = por %p694_p12, %p693_p11 }
 0x1b8   : > { %p696_p0 = pnand %p695_p13, %p689_p8 }
 0x1ba   : > { %699 = shalt.err (!%p696_p0)
}
 0x1bb   : > { %618 = dma.vmem_to_hbm [thread:$0]  (%p808_p5), %s858_s15, 128, %s856_s23, %s442_s22  }
 0x1bc PF: > { %p624_p1 = scmp.ge.s32.totalorder %s734_s21, 2  ;;  %s474_s12 = sand.u32 1, %s722_s18  }
 0x1bd   : > { %s475_s13 = scalar_lea.sflag [#allocation3], %s474_s12 }
 0x1be   : > { %p621_p2 = pnand %p624_p1, %p812_p6 }
 0x1c0   : > { %717 = dma.done.wait (!%p621_p2), %s475_s13, 128  }
 0x1c1   : > { %719 = vsyncadd (!%p621_p2), %s475_s13, 4294967168  ;;  %p16_p3 = scmp.ge.s32.totalorder %s795_s24, 4   ;;  %s907_s18 = smov %s726_s19 }
 0x1c2   : > { %s908_s19 = smov %s730_s20  ;;  %s909_s20 = smov %s806_s27 }
 0x1c3   : > { %s910_s21 = smov %s795_s24  ;;  %18 = sbr.rel (!%p16_p3) target bundleno = 3 (0x3), region = 86 }
 0x1ca   :  { %487 = vsyncpa [#allocation3], 1 }
 0x1cb   :  { %489 = vsyncpa [#allocation3 + $0x1], 1 }

</bundles_post_ra>
